<compile_context>
chip_gen: v5e
topology: v5e:2x2
jax: 0.10.0
libtpu: 0.0.40
codegen_flags: <defaults>
</compile_context>

<pallas_src>
import jax
import jax.numpy as jnp
from jax.experimental import pallas as pl
from jax.experimental.pallas import tpu as pltpu

_LANE = 128


def _round_up(v, m):
    return ((v + m - 1) // m) * m


def _vmem_budgets():
    """Generation-aware (compiler vmem limit, per-tile VMEM budget) in bytes."""
    try:
        info = pltpu.get_tpu_info()
        cap = int(getattr(info, "vmem_capacity_bytes", 0)) or 64 * 1024 * 1024
    except Exception:
        cap = 64 * 1024 * 1024           # conservative: v7x physical VMEM
    vmem_limit = min((cap * 3) // 4, 96 * 1024 * 1024)   # 48 MiB v7x, 96 MiB v5e/v6e
    tile_budget = min(cap // 4, 32 * 1024 * 1024)        # 16 MiB v7x, 32 MiB v5e/v6e
    return int(vmem_limit), int(tile_budget)


def _pick_spatial_tile(hw, n, cin_blk, cout, *, io_bytes, tile_vmem_budget,
                       max_thw=32768, min_steps=4):
    """Largest lane-aligned spatial tile under the VMEM budget.

    Budget covers the double-buffered input/output tiles (io dtype, with
    sublane-padded channel counts) plus the f32 accumulator scratch.  Keeps
    >= min_steps (n, spatial) grid steps when possible so v7x's two
    TensorCores each get >= 2 steps of the mem-bound DMA stream.
    """
    sub = 8 if io_bytes >= 4 else 16
    cin_p = _round_up(cin_blk, sub)
    cout_p = _round_up(cout, sub)
    bytes_per_lane = 2 * io_bytes * (cin_p + cout_p) + 4 * _round_up(cout, 8)
    budget_lanes = max(_LANE, tile_vmem_budget // bytes_per_lane)
    cap = max(_LANE, min(max_thw, (budget_lanes // _LANE) * _LANE))
    t_hw = hw if hw <= cap else cap
    if n * pl.cdiv(hw, t_hw) < min_steps and hw > _LANE:
        target_j = pl.cdiv(min_steps, n)
        t_hw = min(t_hw, max(_LANE, _round_up(pl.cdiv(hw, target_j), _LANE)))
    return int(t_hw)


def _outconv_kernel(b_ref, w_ref, x_ref, o_ref, acc_ref):
    """One (batch, spatial-tile, Cin-block) grid step of the 1x1 conv.

    acc(Cout, t_hw) += W(Cout, cin_blk) @ x(cin_blk, t_hw) on the MXU; bias is
    added from SMEM scalars once per output tile at the last Cin block, and the
    result is stored as a single lane-dense block.
    """
    k = pl.program_id(2)

    @pl.when(k == 0)
    def _init():
        acc_ref[...] = jnp.zeros_like(acc_ref)

    acc_ref[...] += jnp.dot(
        w_ref[...].astype(jnp.float32),
        x_ref[0].astype(jnp.float32),
        preferred_element_type=jnp.float32,
    )

    @pl.when(k == pl.num_programs(2) - 1)
    def _finalize():
        cout = acc_ref.shape[0]
        acc = acc_ref[...]
        # Bias scalars from SMEM; Cout is small/static so this unrolls to a few
        # broadcast adds, once per output tile (not per FMA / per grid step).
        rows = [acc[co:co + 1, :] + b_ref[co] for co in range(cout)]
        o_ref[0] = jnp.concatenate(rows, axis=0).astype(o_ref.dtype)


def outconv_pallas(x_nchw, weight, bias, *, cin_block=None, io_dtype=None):
    """1x1 conv (OutConv.forward), NCHW in / NCHW out.

    x_nchw   : (N, Cin, H, W)
    weight   : (Cout, Cin, 1, 1)   (PyTorch Conv2d weight layout)
    bias     : (Cout,)
    cin_block: optional Cin reduction-block size (128-aligned divisor of Cin);
               only useful for very large Cin.
    io_dtype : optional HBM dtype for x / output (e.g. jnp.bfloat16); compute
               stays f32 inside the kernel.
    returns  : (N, Cout, H, W)
    """
    N, Cin, H, W = x_nchw.shape
    Cout = weight.shape[0]
    HW = H * W

    io_dtype = jnp.dtype(io_dtype) if io_dtype is not None else jnp.dtype(x_nchw.dtype)
    io_bytes = io_dtype.itemsize

    x_flat = x_nchw.reshape(N, Cin, HW).astype(io_dtype)   # reshape is free; no transpose
    w2d = weight.reshape(Cout, Cin).astype(jnp.float32)
    b1d = bias.reshape(Cout).astype(jnp.float32)

    # Cin reduction-axis blocking: only when Cin is very large, and only with
    # 128-aligned divisors so the (Cout, cin_block) weight block stays legal.
    if cin_block is None:
        cin_block = Cin
        if Cin > 512:
            for cand in (512, 256, 128):
                if Cin % cand == 0:
                    cin_block = cand
                    break
    if cin_block != Cin and (Cin % cin_block != 0 or cin_block % _LANE != 0):
        cin_block = Cin
    k_tiles = Cin // cin_block

    vmem_limit, tile_budget = _vmem_budgets()
    t_hw = _pick_spatial_tile(HW, N, cin_block, Cout,
                              io_bytes=io_bytes, tile_vmem_budget=tile_budget)
    grid = (N, pl.cdiv(HW, t_hw), k_tiles)

    b_spec = pl.BlockSpec(memory_space=pltpu.MemorySpace.SMEM)
    w_spec = pl.BlockSpec((Cout, cin_block), lambda n, j, k: (0, k))
    x_spec = pl.BlockSpec((1, cin_block, t_hw), lambda n, j, k: (n, k, j))
    out_spec = pl.BlockSpec((1, Cout, t_hw), lambda n, j, k: (n, 0, j))

    out_flat = pl.pallas_call(
        _outconv_kernel,
        out_shape=jax.ShapeDtypeStruct((N, Cout, HW), io_dtype),
        grid_spec=pltpu.PrefetchScalarGridSpec(
            num_scalar_prefetch=0,
            grid=grid,
            in_specs=[b_spec, w_spec, x_spec],
            out_specs=out_spec,
            scratch_shapes=[pltpu.VMEM((Cout, t_hw), jnp.float32)],
        ),
        compiler_params=pltpu.CompilerParams(
            dimension_semantics=("parallel", "parallel", "arbitrary"),
            vmem_limit_bytes=vmem_limit,
        ),
    )(b1d, w2d, x_flat)

    return out_flat.reshape(N, Cout, H, W)     # free reshape, no transpose


if __name__ == "__main__":
    def run_case(cin, cout, n, h, w, key, *, cin_block=None, io_dtype=None,
                 atol=1e-5, rtol=1e-5):
        kx, kw, kb = jax.random.split(key, 3)
        x = jax.random.normal(kx, (n, cin, h, w), dtype=jnp.float32)
        # Deterministic init mimicking nn.Conv2d default (uniform in
        # [-1/sqrt(fan_in), 1/sqrt(fan_in)], fan_in = in_channels * 1 * 1).
        bound = 1.0 / (cin ** 0.5)
        weight = jax.random.uniform(kw, (cout, cin, 1, 1), jnp.float32, -bound, bound)
        bias = jax.random.uniform(kb, (cout,), jnp.float32, -bound, bound)

        y = outconv_pallas(x, weight, bias, cin_block=cin_block, io_dtype=io_dtype)
        y = jax.block_until_ready(y)

        ref = jnp.einsum("nchw,oc->nohw", x, weight.reshape(cout, cin))
        ref = ref + bias[None, :, None, None]
        assert y.shape == (n, cout, h, w)
        ok = jnp.allclose(y.astype(jnp.float32), ref, atol=atol, rtol=rtol)
        assert bool(ok), float(jnp.max(jnp.abs(y.astype(jnp.float32) - ref)))

    key = jax.random.PRNGKey(0)
    k1, k2, k3, k4 = jax.random.split(key, 4)
    # OutConv config from the spec (tiny channels), f32 exact path.
    run_case(4, 3, 2, 16, 16, k1)
    # Larger channel counts, single Cin block.
    run_case(32, 16, 2, 16, 16, k2)
    # Very large Cin: exercises the Cin-reduction grid axis + accumulator.
    run_case(256, 16, 1, 16, 16, k3, cin_block=128, atol=1e-4, rtol=1e-4)
    # bf16 I/O mode (HBM-halving option), looser tolerance.
    run_case(4, 3, 2, 16, 16, k4, io_dtype=jnp.bfloat16, atol=5e-2, rtol=5e-2)

    print("KERNEL_OK")
</pallas_src>

<mosaic_0001>
module attributes {stable_mosaic.version = 11 : i64} {
  func.func @_outconv_kernel(%arg0: i32, %arg1: i32, %arg2: i32, %arg3: memref<3xf32, #tpu.memory_space<smem>>, %arg4: memref<3x4xf32, #tpu.memory_space<vmem>>, %arg5: memref<1x4x128xf32, #tpu.memory_space<vmem>>, %arg6: memref<1x3x128xf32, #tpu.memory_space<vmem>>, %arg7: memref<3x128xf32, #tpu.memory_space<vmem>>) attributes {dimension_semantics = [#tpu.dimension_semantics<parallel>, #tpu.dimension_semantics<parallel>, #tpu.dimension_semantics<arbitrary>], iteration_bounds = array<i64: 2, 2, 1>, scalar_prefetch = 0 : i64, scratch_operands = 1 : i64, tpu.core_type = #tpu.core_type<tc>, window_params = [{transform_indices = @transform_0, window_bounds = array<i64: 3>}, {transform_indices = @transform_1, window_bounds = array<i64: 3, 4>}, {transform_indices = @transform_2, window_bounds = array<i64: 1, 4, 128>}, {transform_indices = @transform_3, window_bounds = array<i64: 1, 3, 128>}]} {
    %c0_i32 = arith.constant 0 : i32
    %0 = arith.cmpi eq, %arg2, %c0_i32 : i32
    %1 = arith.extui %0 : i1 to i32
    %c0_i32_0 = arith.constant 0 : i32
    %2 = arith.cmpi ne, %1, %c0_i32_0 : i32
    scf.if %2 {
      %cst_11 = arith.constant 0.000000e+00 : f32
      %13 = vector.broadcast %cst_11 : f32 to vector<3x128xf32>
      %c0_12 = arith.constant 0 : index
      %c0_13 = arith.constant 0 : index
      %14 = vector.load %arg7[%c0_12, %c0_13] : memref<3x128xf32, #tpu.memory_space<vmem>>, vector<3x128xf32>
      tpu.vector_store %arg7[%c0_12, %c0_13], %13 {strides = array<i32>} : memref<3x128xf32, #tpu.memory_space<vmem>>, vector<3x128xf32>,
    } else {
    }
    %c0 = arith.constant 0 : index
    %c0_1 = arith.constant 0 : index
    %3 = vector.load %arg7[%c0, %c0_1] : memref<3x128xf32, #tpu.memory_space<vmem>>, vector<3x128xf32>
    %c0_2 = arith.constant 0 : index
    %c0_3 = arith.constant 0 : index
    %4 = vector.load %arg4[%c0_2, %c0_3] : memref<3x4xf32, #tpu.memory_space<vmem>>, vector<3x4xf32>
    %c0_4 = arith.constant 0 : index
    %c0_5 = arith.constant 0 : index
    %c0_6 = arith.constant 0 : index
    %5 = vector.load %arg5[%c0_4, %c0_5, %c0_6] : memref<1x4x128xf32, #tpu.memory_space<vmem>>, vector<1x4x128xf32>
    %6 = vector.shape_cast %5 : vector<1x4x128xf32> to vector<4x128xf32>
    %cst = arith.constant dense<0.000000e+00> : vector<3x128xf32>
    %7 = tpu.matmul %4, %6, %cst {dimension_numbers = #tpu.dot_dimension_numbers<[1], [0], [0], [1], [0, 0, 1, 1], [], []>} : vector<3x4xf32>, vector<4x128xf32>, vector<3x128xf32> -> vector<3x128xf32>
    %8 = arith.addf %3, %7 : vector<3x128xf32>
    %c0_7 = arith.constant 0 : index
    %c0_8 = arith.constant 0 : index
    %9 = vector.load %arg7[%c0_7, %c0_8] : memref<3x128xf32, #tpu.memory_space<vmem>>, vector<3x128xf32>
    tpu.vector_store %arg7[%c0_7, %c0_8], %8 {strides = array<i32>} : memref<3x128xf32, #tpu.memory_space<vmem>>, vector<3x128xf32>,
    %c0_i32_9 = arith.constant 0 : i32
    %10 = arith.cmpi eq, %arg2, %c0_i32_9 : i32
    %11 = arith.extui %10 : i1 to i32
    %c0_i32_10 = arith.constant 0 : i32
    %12 = arith.cmpi ne, %11, %c0_i32_10 : i32
    scf.if %12 {
      %c0_11 = arith.constant 0 : index
      %c0_12 = arith.constant 0 : index
      %13 = vector.load %arg7[%c0_11, %c0_12] : memref<3x128xf32, #tpu.memory_space<vmem>>, vector<3x128xf32>
      %14 = vector.extract_strided_slice %13 {offsets = [0, 0], sizes = [1, 128], strides = [1, 1]} : vector<3x128xf32> to vector<1x128xf32>
      %c0_13 = arith.constant 0 : index
      %15 = memref.load %arg3[%c0_13] : memref<3xf32, #tpu.memory_space<smem>>
      %16 = vector.broadcast %15 : f32 to vector<1x128xf32>
      %17 = arith.addf %14, %16 : vector<1x128xf32>
      %18 = vector.extract_strided_slice %13 {offsets = [1, 0], sizes = [1, 128], strides = [1, 1]} : vector<3x128xf32> to vector<1x128xf32>
      %c1 = arith.constant 1 : index
      %19 = memref.load %arg3[%c1] : memref<3xf32, #tpu.memory_space<smem>>
      %20 = vector.broadcast %19 : f32 to vector<1x128xf32>
      %21 = arith.addf %18, %20 : vector<1x128xf32>
      %22 = vector.extract_strided_slice %13 {offsets = [2, 0], sizes = [1, 128], strides = [1, 1]} : vector<3x128xf32> to vector<1x128xf32>
      %c2 = arith.constant 2 : index
      %23 = memref.load %arg3[%c2] : memref<3xf32, #tpu.memory_space<smem>>
      %24 = vector.broadcast %23 : f32 to vector<1x128xf32>
      %25 = arith.addf %22, %24 : vector<1x128xf32>
      %26 = tpu.concatenate %17, %21, %25 in 0 : vector<1x128xf32>, vector<1x128xf32>, vector<1x128xf32> -> vector<3x128xf32>
      %c0_14 = arith.constant 0 : index
      %c0_15 = arith.constant 0 : index
      %c0_16 = arith.constant 0 : index
      %27 = vector.load %arg6[%c0_14, %c0_15, %c0_16] : memref<1x3x128xf32, #tpu.memory_space<vmem>>, vector<1x3x128xf32>
      %28 = vector.shape_cast %27 : vector<1x3x128xf32> to vector<3x128xf32>
      %29 = vector.shape_cast %26 : vector<3x128xf32> to vector<1x3x128xf32>
      tpu.vector_store %arg6[%c0_14, %c0_15, %c0_16], %29 {strides = array<i32>} : memref<1x3x128xf32, #tpu.memory_space<vmem>>, vector<1x3x128xf32>,
    } else {
    }
    return
  }
  func.func @transform_0(%arg0: i32, %arg1: i32, %arg2: i32) -> i32 {
    %c0_i32 = arith.constant 0 : i32
    %c0_i32_0 = arith.constant 0 : i32
    return %c0_i32 : i32
  }
  func.func @transform_1(%arg0: i32, %arg1: i32, %arg2: i32) -> (i32, i32) {
    %c0_i32 = arith.constant 0 : i32
    %c0_i32_0 = arith.constant 0 : i32
    return %c0_i32, %arg2 : i32, i32
  }
  func.func @transform_2(%arg0: i32, %arg1: i32, %arg2: i32) -> (i32, i32, i32) {
    %c0_i32 = arith.constant 0 : i32
    return %arg0, %arg2, %arg1 : i32, i32, i32
  }
  func.func @transform_3(%arg0: i32, %arg1: i32, %arg2: i32) -> (i32, i32, i32) {
    %c0_i32 = arith.constant 0 : i32
    %c0_i32_0 = arith.constant 0 : i32
    return %arg0, %c0_i32, %arg1 : i32, i32, i32
  }
}

</mosaic_0001>

<bundles_post_ra>
// kernel: tpu_custom_call.1
= control target key start
LH: loop header
LB: loop body
LE: loop exit
PB: predicated region body
PF: predicated region fallthrough
CT: control target
= control target key end

     0   :  { %s875_s0 = inlined_call_operand.hbm [shape: f32[3], index: 0, kind: input, shape index: {}]   ;;  %s876_s1 = inlined_call_operand.hbm [shape: f32[3,4], index: 1, kind: input, shape index: {}]   ;;  %s877_s2 = inlined_call_operand.hbm [shape: f32[2,4,256], index: 2, kind: input, shape index: {}]   ;;  %s878_s3 = inlined_call_operand.vmem [shape: f32[2,3,256], index: 3, kind: output, shape index: {}]  }
   0x1   :  { %880 = sst [smem:[#allocation13_spill]] %s875_s0 }
   0x2   :  { %881 = sst [smem:[#allocation14_spill]] %s876_s1 }
   0x3   :  { %8 = vsyncpa [#allocation5], 0 }
   0x4   :  { %9 = vsyncpa [#allocation4], 0 }
   0x5   :  { %10 = vsyncpa [#allocation8], 0 }
   0x6   :  { %12 = vsyncpa [#allocation8 + $0x1], 0  ;;  %s730_s12 = smov 0   ;;  %s732_s13 = smov 0  }
   0x7   :  { %s734_s14 = smov 0   ;;  %s736_s15 = smov 0  }
   0x8   :  { %s738_s16 = smov 0   ;;  %s740_s17 = smov 0  }
   0x9   :  { %s742_s18 = smov 0   ;;  %s744_s19 = smov 0  }
   0xa LB: > { %s442_s20 = sadd.s32 4294967295, %s705_s19   ;;  %p108_p0 = scmp.ne.s32.totalorder %s681_s13, %s677_s12  ;;  %s705_s19 = sphi %s744_s19, %s18_s19   ;;  %s701_s18 = sphi %s742_s18, %s896_s18   ;;  %s697_s17 = sphi %s740_s17, %s895_s17   ;;  %s693_s16 = sphi %s738_s16, %s894_s16   ;;  %s689_s15 = sphi %s736_s15, %s893_s15   ;;  %s685_s14 = sphi %s734_s14, %s892_s14   ;;  %s681_s13 = sphi %s732_s13, %s891_s13   ;;  %s677_s12 = sphi %s730_s12, %s890_s12  }
   0xb   : > { %p770_p1 = scmp.eq.s32.totalorder %s442_s20, 0  ;;  %p444_p2 = scmp.ge.s32.totalorder %s705_s19, 1 }
   0xc   : > { %p147_p3 = scmp.lt.s32.totalorder %s705_s19, 5  ;;  %s884_s0 = sld [smem:[#allocation13_spill]] }
   0xd   : > { %p778_p4 = por %p770_p1, %p108_p0  ;;  %s886_s1 = sld [smem:[#allocation14_spill]] }
   0xe   : > { %p785_p5 = pnand %p444_p2, %p147_p3  ;;  %s707_s30 = smov [#allocation6]  }
   0xf   : > { %s173_s4 = sshll.u32 %s707_s30, 4  ;;  %s708_s5 = smov [#allocation3]   ;;  %s174_s4 = int_to_ptr.vmem [resolvable:$true] %s173_s4 }
  0x10   : > { %p473_p6 = pneg %p785_p5  ;;  %s33_s6 = sadd.s32 1, %s697_s17 }
  0x11   : > { %s37_s7 = sadd.s32 1, %s701_s18  ;;  %p35_p8 = scmp.ge.s32.totalorder %s33_s6, 2 }
  0x12   : > { %s159_s25 = sshll.u32 %s884_s0, 4  ;;  %p474_p7 = pnand %p473_p6, %p770_p1  ;;  %s160_s25 = int_to_ptr.hbm [resolvable:$true] %s159_s25 }
  0x13   : > { %s171_s29 = sshll.u32 %s886_s1, 4  ;;  %s95_s8 = sadd.s32 1, %s685_s14  ;;  %s172_s29 = int_to_ptr.hbm [resolvable:$true] %s171_s29 }
  0x14   : > { %476 = dma.hbm_to_smem (!%p474_p7), %s160_s25, 16, %s708_s5, [#allocation5]  }
  0x15   : > { %479 = dma.hbm_to_vmem [thread:$0]  (!%p474_p7), %s172_s29, 64, %s174_s4, [#allocation4]  }
  0x16   : > { %p102_p9 = scmp.ne.s32.totalorder %s685_s14, %s681_s13  ;;  %p103_p10 = scmp.eq.s32.totalorder %s705_s19, 0 }
  0x17   : > { %s898_s6 = smov (%p35_p8, %s33_s6), 0  ;;  %s900_s7 = smov (!%p35_p8, %s37_s7), %s701_s18 }
  0x18   : > { %887 = sst [smem:[#allocation12_spill]] %s898_s6  ;;  %s91_s9 = ssub.s32 %s697_s17, %s898_s6 }
  0x19   : > { %p807_p11 = por %p103_p10, %p102_p9  ;;  %p39_p12 = scmp.ge.s32.totalorder %s900_s7, 2 }
  0x1a   : > { %p486_p13 = scmp.lt.s32.totalorder %s705_s19, 4  ;;  %s184_s11 = sand.u32 1, %s685_s14  }
  0x1b   : > { %s449_s12 = sshll.u32 %s701_s18, 1  ;;  %s902_s7 = smov (%p39_p12, %s900_s7), 0 }
  0x1c   : > { %s448_s20 = sshll.u32 %s184_s11, 2  ;;  %s88_s23 = ssub.s32 %s701_s18, %s902_s7 }
  0x1d   : > { %s92_s24 = sor.u32 %s91_s9, %s88_s23  ;;  %s194_s25 = sadd.s32 %s697_s17, %s449_s12 }
  0x1e   : > { %p93_p0 = scmp.eq.s32.totalorder %s92_s24, 0  ;;  %s450_s27 = sshll.u32 %s194_s25, 2 }
  0x1f   : > { %s196_s30 = scalar_lea.hbm %s877_s2, %s450_s27  ;;  %s188_s4 = scalar_lea.vmem [#allocation7], %s448_s20 }
  0x20   : > { %s200_s5 = sshll.u32 %s188_s4, 4  ;;  %s198_s1 = sshll.u32 %s196_s30, 4  ;;  %s201_s5 = int_to_ptr.vmem [resolvable:$true] %s200_s5  ;;  %s199_s1 = int_to_ptr.hbm [resolvable:$true] %s198_s1 }
  0x21   : > { %s823_s0 = scalar_select %p93_p0, %s685_s14, %s95_s8  }
  0x22   : > { %p481_p2 = pnand %p486_p13, %p807_p11  ;;  %s185_s6 = scalar_lea.sflag [#allocation8], %s184_s11 }
  0x23   : > { %209 = sbr.rel (%p785_p5) target bundleno = 192 (0xc0), region = 32 }
  0x24   : > { %483 = dma.hbm_to_vmem [thread:$0]  (!%p481_p2), %s199_s1, 64, %s201_s5, %s185_s6  }
  0x28   : > { %664 = dma.done.wait (%p770_p1), [#allocation5], 16  }
  0x29   : > { %666 = vsyncadd (%p770_p1), [#allocation5], 4294967280 }
  0x2a   : > { %668 = dma.done.wait (%p770_p1), [#allocation4], 64  }
  0x2b   : > { %670 = vsyncadd (%p770_p1), [#allocation4], 4294967232  ;;  %s221_s8 = sand.u32 1, %s681_s13  }
  0x2c   : > { %s454_s9 = sshll.u32 %s221_s8, 2  ;;  %s222_s1 = scalar_lea.sflag [#allocation8], %s221_s8 }
  0x2d   : > { %s225_s6 = scalar_lea.vmem [#allocation7], %s454_s9 }
  0x2e   : > { %672 = dma.done.wait (%p778_p4), %s222_s1, 64  }
  0x2f   : > { %674 = vsyncadd (%p778_p4), %s222_s1, 4294967232 }
  0x30   : > { %231 = sfence }
  0x31   : > { %v268_v0 = vld [vmem:[%s225_s6] sm:$0xf]  ;;  %vm273_vm0 = vcmask 1043456   ;;  %v267_v1 = vld [vmem:[#allocation6] sm:$0x7]  ;;  %vm269_vm1 = vcmask 31744  }
  0x32   : > { %457 = vmatpush.msk.msra.mxu0 %vm273_vm0, %v268_v0  ;;  %v709_v2 = vmov 0.0   ;;  %p253_p1 = scmp.lt.s32.totalorder %s693_s16, 1  ;;  %p255_p3 = scmp.lt.s32.totalorder %s689_s15, 1  ;;  %vm312_vm2 = vcmask 1040384   ;;  %vm314_vm3 = vcmask 1041408  }
  0x33   : > { %458 = vmatmul.msk.f32.vlgmr.msra.gmra.mxu0 %vm269_vm1, %v267_v1  ;;  %265 = vst [vmem:[#allocation2] sm:$0x7] %v709_v2  ;;  %s303_s21 = sld [smem:[#allocation3]] }
  0x34   : > { %s904_s16 = smov (!%p253_p1, %s693_s16), 1  ;;  %s459_s22 = sld [smem:[#allocation3 + $0x1]] }
  0x35   : > { %s460_s26 = sld [smem:[#allocation3 + $0x2]]  ;;  %s906_s15 = smov (!%p255_p3, %s689_s15), 1 }
  0x36   : > { %s455_s10 = sshll.u32 %s904_s16, 1 }
  0x37   : > { %s258_s11 = sadd.s32 %s455_s10, %s906_s15 }
  0x38   : > { %s456_s12 = sshll.u32 %s258_s11, 2 }
  0x39   : > { %v304_v6 = vstv %s303_s21  ;;  %s260_s24 = scalar_lea.vmem %s878_s3, %s456_s12 }
  0x3a   : > { %v266_v3 = vld [vmem:[#allocation2] sm:$0x7]  ;;  %v307_v7 = vstv %s459_s22 }
  0x3b   : > { %v310_v8 = vstv %s460_s26 }
  0xb0   : > { %v294_v4 = vpop.f32.mrf.mxu0 }
  0xb1   : > { %v297_v5 = vadd.f32 %v294_v4, %v266_v3 }
  0xb3   : > { %298 = vst [vmem:[#allocation2] sm:$0x7] %v297_v5 }
  0xba   : > { %v302_v9 = vld [vmem:[#allocation2] sm:$0x7] }
  0xbb   : > { %v305_v10 = vadd.f32 %v304_v6, %v302_v9  ;;  %v308_v11 = vadd.f32 %v307_v7, %v302_v9  ;;  %v311_v12 = vadd.f32 %v310_v8, %v302_v9 }
  0xbd   : > { %v313_v13 = vsel %vm312_vm2, %v305_v10, %v308_v11 }
  0xbe   : > { %v315_v14 = vsel %vm314_vm3, %v313_v13, %v311_v12 }
  0xbf   : > { %316 = vst [vmem:[%s260_s24] sm:$0x7] %v315_v14 }
  0xc0 PF: > { %s18_s19 = sadd.s32 1, %s705_s19   ;;  %s889_s25 = sld [smem:[#allocation12_spill]] }
  0xc1   : > { %p15_p4 = scmp.ge.s32.totalorder %s18_s19, 6   ;;  %s890_s12 = smov %s681_s13 }
  0xc2   : > { %s891_s13 = smov %s685_s14  ;;  %s892_s14 = smov %s823_s0 }
  0xc3   : > { %s893_s15 = smov %s697_s17  ;;  %s894_s16 = smov %s701_s18 }
  0xc4   : > { %s896_s18 = smov %s902_s7  ;;  %17 = sbr.rel (!%p15_p4) target bundleno = 10 (0xa), region = 91 }
  0xc6   : > { %s895_s17 = smov %s889_s25 }
  0xc9   :  { %344 = vsyncpa [#allocation4], 1 }
  0xca   :  { %346 = vsyncpa [#allocation4 + $0x1], 1 }
  0xcb   :  { %347 = vsyncpa [#allocation8], 1 }
  0xcc   :  { %349 = vsyncpa [#allocation8 + $0x1], 1 }
  0xcd   :  { %350 = vsyncpa [#allocation5], 1 }
  0xce   :  { %352 = vsyncpa [#allocation5 + $0x1], 1 }

</bundles_post_ra>
